<compile_context>
chip_gen: v6e
topology: v6e:2x2x1
jax: 0.10.0
libtpu: 0.0.40
codegen_flags: <defaults>
</compile_context>

<pallas_src>
import functools

import jax
import jax.numpy as jnp
from jax.experimental import pallas as pl
from jax.experimental.pallas import tpu as pltpu

LANES = 128
SUBLANES = 8
TM_MAX = 4096  # rows per tile: (4096, 128) f32 = 2 MiB per input block
NUM_PARTS = 2  # leading "parallel" grid axis (megacore / dual-TC sharding)


def _sublane_quantum(dtype) -> int:
    # Sub-32-bit dtypes pack along sublanes: bf16 needs 16-row tiles, 8-bit 32.
    itemsize = jnp.dtype(dtype).itemsize
    return max(SUBLANES, (4 // itemsize) * SUBLANES)


def _masked_mse_kernel(yhat_ref, y_ref, sum_ref, cnt_ref, *,
                       rows, tiles_per_part, ignore_value, need_row_mask):
    p = pl.program_id(0)   # part (parallel axis)
    i = pl.program_id(1)   # row tile within the part (reduction axis, last)

    @pl.when(i == 0)
    def _():
        sum_ref[...] = jnp.zeros_like(sum_ref)
        cnt_ref[...] = jnp.zeros_like(cnt_ref)

    tm, lanes = y_ref.shape
    # Upcast per tile (no wrapper-side f32 materialization in HBM).  The mask
    # compares the upcast value against float32(ignore_value), matching the
    # PyTorch reference's float promotion for f32 inputs.
    y = y_ref[...].astype(jnp.float32)
    y_hat = yhat_ref[...].astype(jnp.float32)
    valid_base = y != jnp.float32(ignore_value)

    def accumulate(valid):
        # Select (not mask-multiply) so garbage in masked slots can never
        # inject NaN/Inf into the sums.
        diff = jnp.where(valid, y_hat - y, jnp.float32(0.0))
        sq = diff * diff
        cnt = valid.astype(jnp.float32)
        # Fold (tm, 128) -> (8, 128): pure vreg adds on the VPU; the single
        # cross-lane (XLU) reduction happens once, in the JAX wrapper.
        sum_ref[...] += sq.reshape(tm // SUBLANES, SUBLANES, lanes).sum(axis=0)
        cnt_ref[...] += cnt.reshape(tm // SUBLANES, SUBLANES, lanes).sum(axis=0)

    if not need_row_mask:
        # Fast path: every tile is full and in range -> no iota, no bound check.
        accumulate(valid_base)
    else:
        row0 = (p * tiles_per_part + i) * tm
        is_full = row0 + tm <= rows

        @pl.when(is_full)
        def _():
            accumulate(valid_base)

        @pl.when(jnp.logical_not(is_full))
        def _():
            # Partial boundary tile, or a clamped duplicate tile past the end:
            # mask out rows >= `rows` so stale VMEM data contributes nothing.
            row_ids = jax.lax.broadcasted_iota(jnp.int32, (tm, lanes), 0)
            accumulate(valid_base & ((row0 + row_ids) < rows))


def _cdiv(a, b):
    return -(-a // b)


def masked_mse_loss(y_hat, y, ignore_value):
    """sum(((y_hat - y)**2) * mask) / sum(mask), mask = (y != ignore_value)."""
    assert y_hat.shape == y.shape
    ignore_f = jnp.float32(ignore_value)

    yh_flat = jnp.ravel(y_hat)
    yt_flat = jnp.ravel(y)
    n = yh_flat.shape[0]

    quantum = max(_sublane_quantum(y_hat.dtype), _sublane_quantum(y.dtype))
    fold = quantum * LANES
    n_bulk = (n // fold) * fold
    rows = n_bulk // LANES          # multiple of `quantum` (>= 8)

    # Tiny tail (< fold elements): plain JAX.  Avoids any whole-array pad copy
    # and any lane-granular masking inside the hot kernel loop.
    # NOTE(semantics): for sub-f32 inputs the sentinel comparison happens after
    # upcasting to f32, matching the f32 reference exactly for f32 inputs.
    if n_bulk < n:
        ty = yt_flat[n_bulk:].astype(jnp.float32)
        tyh = yh_flat[n_bulk:].astype(jnp.float32)
        tmask = ty != ignore_f
        tail_sum = jnp.sum(jnp.where(tmask, (tyh - ty) ** 2, jnp.float32(0.0)))
        tail_cnt = jnp.sum(tmask.astype(jnp.float32))
    else:
        tail_sum = jnp.float32(0.0)
        tail_cnt = jnp.float32(0.0)

    if rows == 0:
        # Input smaller than one (quantum, 128) slab: pure JAX.
        return tail_sum / tail_cnt

    # Lane-dense 2D view; a free reshape when n is a multiple of `fold`
    # (the common case), a prefix-slice of the bulk otherwise.
    yh2d = yh_flat[:n_bulk].reshape(rows, LANES)
    yt2d = yt_flat[:n_bulk].reshape(rows, LANES)

    tm = rows if rows <= TM_MAX else TM_MAX       # multiple of `quantum`
    num_tiles = _cdiv(rows, tm)
    num_parts = NUM_PARTS if num_tiles >= NUM_PARTS else 1
    tiles_per_part = _cdiv(num_tiles, num_parts)
    grid = (num_parts, tiles_per_part)

    exact_tiles = (num_parts * tiles_per_part == num_tiles)
    need_row_mask = (rows % tm != 0) or (not exact_tiles)

    if exact_tiles:
        def in_index_map(p, i):
            return (p * tiles_per_part + i, 0)
    else:
        def in_index_map(p, i):
            # Clamp the DMA window into the array; the duplicated tile is
            # zeroed in-kernel by the row mask.
            return (jnp.minimum(p * tiles_per_part + i, num_tiles - 1), 0)

    kernel = functools.partial(
        _masked_mse_kernel,
        rows=rows,
        tiles_per_part=tiles_per_part,
        ignore_value=float(ignore_value),
        need_row_mask=need_row_mask,
    )

    out_shape = (
        jax.ShapeDtypeStruct((num_parts * SUBLANES, LANES), jnp.float32),
        jax.ShapeDtypeStruct((num_parts * SUBLANES, LANES), jnp.float32),
    )

    sums, cnts = pl.pallas_call(
        kernel,
        out_shape=out_shape,
        grid_spec=pltpu.PrefetchScalarGridSpec(
            num_scalar_prefetch=0,
            grid=grid,
            in_specs=[
                pl.BlockSpec((tm, LANES), in_index_map),
                pl.BlockSpec((tm, LANES), in_index_map),
            ],
            out_specs=[
                pl.BlockSpec((SUBLANES, LANES), lambda p, i: (p, 0)),
                pl.BlockSpec((SUBLANES, LANES), lambda p, i: (p, 0)),
            ],
        ),
        compiler_params=pltpu.CompilerParams(
            dimension_semantics=("parallel", "arbitrary"),
        ),
    )(yh2d, yt2d)

    # Single cross-lane reduction + divide in plain JAX (per-part partial
    # blocks make the dual-TC split race-free).  NOTE: if every element equals
    # ignore_value this divides by zero, matching the PyTorch reference.
    total_sum = jnp.sum(sums) + tail_sum
    total_cnt = jnp.sum(cnts) + tail_cnt
    return total_sum / total_cnt


def _reference(y_hat, y, ignore_value):
    mask = (y != ignore_value).astype(jnp.float32)
    sq = (y_hat - y) ** 2
    return jnp.sum(sq * mask) / jnp.sum(mask)


def _make_inputs(key, shape, ignore_value, p=0.25):
    k1, k2, k3 = jax.random.split(key, 3)
    y_hat = jax.random.normal(k1, shape, dtype=jnp.float32)
    y = jax.random.normal(k2, shape, dtype=jnp.float32)
    ignore_mask = jax.random.bernoulli(k3, p=p, shape=shape)
    y = jnp.where(ignore_mask, jnp.float32(ignore_value), y)
    return y_hat, y


if __name__ == "__main__":
    ignore_value = -999.0
    key = jax.random.PRNGKey(0)

    shapes = [
        (2, 4, 16, 16),      # primary small NCHW case: single tile, fast path
        (4, 8, 96, 96),      # single full tile, no masking anywhere
        (2, 3, 17, 19),      # odd size: exercises the tiny JAX tail path
        (1, 1, 3000, 1024),  # multi-tile: 2-part grid + partial boundary tile
    ]
    keys = jax.random.split(key, len(shapes))

    for k, shape in zip(keys, shapes):
        y_hat, y = _make_inputs(k, shape, ignore_value)
        loss = jax.block_until_ready(masked_mse_loss(y_hat, y, ignore_value))
        ref = jax.block_until_ready(_reference(y_hat, y, ignore_value))
        assert jnp.allclose(loss, ref, rtol=1e-4, atol=1e-6), (shape, loss, ref)

    print("KERNEL_OK")
</pallas_src>

<mosaic_0001>
module attributes {stable_mosaic.version = 11 : i64} {
  func.func @_masked_mse_kernel(%arg0: i32, %arg1: i32, %arg2: memref<16x128xf32, #tpu.memory_space<vmem>>, %arg3: memref<16x128xf32, #tpu.memory_space<vmem>>, %arg4: memref<8x128xf32, #tpu.memory_space<vmem>>, %arg5: memref<8x128xf32, #tpu.memory_space<vmem>>) attributes {dimension_semantics = [#tpu.dimension_semantics<parallel>, #tpu.dimension_semantics<arbitrary>], iteration_bounds = array<i64: 1, 1>, scalar_prefetch = 0 : i64, scratch_operands = 0 : i64, tpu.core_type = #tpu.core_type<tc>, window_params = [{transform_indices = @transform_0, window_bounds = array<i64: 16, 128>}, {transform_indices = @transform_1, window_bounds = array<i64: 16, 128>}, {transform_indices = @transform_2, window_bounds = array<i64: 8, 128>}, {transform_indices = @transform_3, window_bounds = array<i64: 8, 128>}]} {
    %c0_i32 = arith.constant 0 : i32
    %0 = arith.cmpi eq, %arg1, %c0_i32 : i32
    %1 = arith.extui %0 : i1 to i32
    %c0_i32_0 = arith.constant 0 : i32
    %2 = arith.cmpi ne, %1, %c0_i32_0 : i32
    scf.if %2 {
      %cst_15 = arith.constant 0.000000e+00 : f32
      %23 = vector.broadcast %cst_15 : f32 to vector<8x128xf32>
      %c0_16 = arith.constant 0 : index
      %c0_17 = arith.constant 0 : index
      %24 = vector.load %arg4[%c0_16, %c0_17] : memref<8x128xf32, #tpu.memory_space<vmem>>, vector<8x128xf32>
      tpu.vector_store %arg4[%c0_16, %c0_17], %23 {strides = array<i32>} : memref<8x128xf32, #tpu.memory_space<vmem>>, vector<8x128xf32>,
      %cst_18 = arith.constant 0.000000e+00 : f32
      %25 = vector.broadcast %cst_18 : f32 to vector<8x128xf32>
      %c0_19 = arith.constant 0 : index
      %c0_20 = arith.constant 0 : index
      %26 = vector.load %arg5[%c0_19, %c0_20] : memref<8x128xf32, #tpu.memory_space<vmem>>, vector<8x128xf32>
      tpu.vector_store %arg5[%c0_19, %c0_20], %25 {strides = array<i32>} : memref<8x128xf32, #tpu.memory_space<vmem>>, vector<8x128xf32>,
    } else {
    }
    %c0 = arith.constant 0 : index
    %c0_1 = arith.constant 0 : index
    %3 = vector.load %arg3[%c0, %c0_1] : memref<16x128xf32, #tpu.memory_space<vmem>>, vector<16x128xf32>
    %c0_2 = arith.constant 0 : index
    %c0_3 = arith.constant 0 : index
    %4 = vector.load %arg2[%c0_2, %c0_3] : memref<16x128xf32, #tpu.memory_space<vmem>>, vector<16x128xf32>
    %cst = arith.constant -9.990000e+02 : f32
    %5 = vector.broadcast %cst : f32 to vector<16x128xf32>
    %6 = arith.cmpf one, %3, %5 : vector<16x128xf32>
    %7 = arith.subf %4, %3 : vector<16x128xf32>
    %cst_4 = arith.constant 0.000000e+00 : f32
    %8 = vector.broadcast %cst_4 : f32 to vector<16x128xf32>
    %9 = arith.select %6, %7, %8 : vector<16x128xi1>, vector<16x128xf32>
    %10 = arith.mulf %9, %9 : vector<16x128xf32>
    %11 = arith.extui %6 : vector<16x128xi1> to vector<16x128xi32>
    %12 = arith.sitofp %11 : vector<16x128xi32> to vector<16x128xf32>
    %c0_5 = arith.constant 0 : index
    %c0_6 = arith.constant 0 : index
    %13 = vector.load %arg4[%c0_5, %c0_6] : memref<8x128xf32, #tpu.memory_space<vmem>>, vector<8x128xf32>
    %14 = vector.shape_cast %10 : vector<16x128xf32> to vector<2x8x128xf32>
    %cst_7 = arith.constant dense<0.000000e+00> : vector<8x128xf32>
    %15 = vector.multi_reduction <add>, %14, %cst_7 [0] : vector<2x8x128xf32> to vector<8x128xf32>
    %16 = arith.addf %13, %15 : vector<8x128xf32>
    %c0_8 = arith.constant 0 : index
    %c0_9 = arith.constant 0 : index
    %17 = vector.load %arg4[%c0_8, %c0_9] : memref<8x128xf32, #tpu.memory_space<vmem>>, vector<8x128xf32>
    tpu.vector_store %arg4[%c0_8, %c0_9], %16 {strides = array<i32>} : memref<8x128xf32, #tpu.memory_space<vmem>>, vector<8x128xf32>,
    %c0_10 = arith.constant 0 : index
    %c0_11 = arith.constant 0 : index
    %18 = vector.load %arg5[%c0_10, %c0_11] : memref<8x128xf32, #tpu.memory_space<vmem>>, vector<8x128xf32>
    %19 = vector.shape_cast %12 : vector<16x128xf32> to vector<2x8x128xf32>
    %cst_12 = arith.constant dense<0.000000e+00> : vector<8x128xf32>
    %20 = vector.multi_reduction <add>, %19, %cst_12 [0] : vector<2x8x128xf32> to vector<8x128xf32>
    %21 = arith.addf %18, %20 : vector<8x128xf32>
    %c0_13 = arith.constant 0 : index
    %c0_14 = arith.constant 0 : index
    %22 = vector.load %arg5[%c0_13, %c0_14] : memref<8x128xf32, #tpu.memory_space<vmem>>, vector<8x128xf32>
    tpu.vector_store %arg5[%c0_13, %c0_14], %21 {strides = array<i32>} : memref<8x128xf32, #tpu.memory_space<vmem>>, vector<8x128xf32>,
    return
  }
  func.func @transform_0(%arg0: i32, %arg1: i32) -> (i32, i32) {
    %c1_i32 = arith.constant 1 : i32
    %0 = arith.muli %arg0, %c1_i32 : i32
    %1 = arith.addi %0, %arg1 : i32
    %c0_i32 = arith.constant 0 : i32
    %c0_i32_0 = arith.constant 0 : i32
    return %1, %c0_i32 : i32, i32
  }
  func.func @transform_1(%arg0: i32, %arg1: i32) -> (i32, i32) {
    %c1_i32 = arith.constant 1 : i32
    %0 = arith.muli %arg0, %c1_i32 : i32
    %1 = arith.addi %0, %arg1 : i32
    %c0_i32 = arith.constant 0 : i32
    %c0_i32_0 = arith.constant 0 : i32
    return %1, %c0_i32 : i32, i32
  }
  func.func @transform_2(%arg0: i32, %arg1: i32) -> (i32, i32) {
    %c0_i32 = arith.constant 0 : i32
    %c0_i32_0 = arith.constant 0 : i32
    return %arg0, %c0_i32 : i32, i32
  }
  func.func @transform_3(%arg0: i32, %arg1: i32) -> (i32, i32) {
    %c0_i32 = arith.constant 0 : i32
    %c0_i32_0 = arith.constant 0 : i32
    return %arg0, %c0_i32 : i32, i32
  }
}

</mosaic_0001>

<bundles_post_ra>
// kernel: tpu_custom_call.1
= control target key start
LH: loop header
LB: loop body
LE: loop exit
PB: predicated region body
PF: predicated region fallthrough
CT: control target
= control target key end

     0   :  { %9 = vsyncpa [#allocation3], 0  ;;  %s251_s0 = inlined_call_operand.hbm [shape: f32[16,128], index: 0, kind: input, shape index: {}]   ;;  %s252_s1 = inlined_call_operand.hbm [shape: f32[16,128], index: 1, kind: input, shape index: {}]   ;;  %s253_s2 = inlined_call_operand.hbm [shape: f32[8,128], index: 2, kind: output, shape index: {0}]   ;;  %s254_s3 = inlined_call_operand.hbm [shape: f32[8,128], index: 3, kind: output, shape index: {1}]  }
   0x1   :  { %10 = vsyncpa [#allocation6], 0 }
   0x2   :  { %11 = vsyncpa [#allocation4], 0 }
   0x3   :  { %12 = vsyncpa [#allocation9], 0  ;;  %s212_s12 = smov [#allocation2]  }
   0x4   :  { %s22_s13 = sshll.u32 %s212_s12, 4  ;;  %s23_s13 = int_to_ptr.vmem [resolvable:$true] %s22_s13 }
   0x5   :  { %s132_s14 = scalar_lea.vmem %s23_s13, 256  ;;  %p137_p1 = scmp.lt.s32.totalorder %s23_s13, %s23_s13 }
   0x6   :  { %p133_p0 = scmp.ne.s32.totalorder %s23_s13, %s132_s14  ;;  %p138_p2 = scmp.lt.s32.totalorder %s132_s14, %s132_s14 }
   0x8   :  { %p139_p3 = por %p138_p2, %p137_p1 }
   0xa   :  { %p140_p4 = pnand %p139_p3, %p133_p0 }
   0xc   :  { %143 = shalt.err (!%p140_p4)
}
   0xd   :  { %s213_s15 = smov 128   ;;  %s214_s16 = smov 8  }
   0xe   :  { %28 = dma.hbm_to_vmem [thread:$0]  %s251_s0, 256, %s23_s13, [#allocation3], %s213_s15, %s213_s15, %s214_s16  }
   0xf   :  { %s215_s19 = smov [#allocation5]  }
  0x10   :  { %s38_s20 = sshll.u32 %s215_s19, 4  ;;  %s39_s20 = int_to_ptr.vmem [resolvable:$true] %s38_s20 }
  0x11   :  { %s152_s21 = scalar_lea.vmem %s39_s20, 256  ;;  %p157_p6 = scmp.lt.s32.totalorder %s39_s20, %s39_s20 }
  0x12   :  { %p153_p5 = scmp.ne.s32.totalorder %s39_s20, %s152_s21  ;;  %p158_p7 = scmp.lt.s32.totalorder %s152_s21, %s152_s21 }
  0x14   :  { %p159_p8 = por %p158_p7, %p157_p6 }
  0x16   :  { %p160_p9 = pnand %p159_p8, %p153_p5 }
  0x18   :  { %163 = shalt.err (!%p160_p9)
}
  0x19   :  { %44 = dma.hbm_to_vmem [thread:$0]  %s252_s1, 256, %s39_s20, [#allocation6], %s213_s15, %s213_s15, %s214_s16  }
  0x1a   :  { %204 = dma.done.wait [#allocation3], 256  }
  0x1b   :  { %205 = vsyncadd [#allocation3], 4294967040 }
  0x1c   :  { %206 = dma.done.wait [#allocation6], 256  }
  0x1d   :  { %207 = vsyncadd [#allocation6], 4294967040  ;;  %v61_v0 = vld [vmem:[#allocation5] sm:$0xff]  ;;  %v62_v1 = vld [vmem:[#allocation5 + $0x8] sm:$0xff]  ;;  %v216_v6 = vmov 0.0   ;;  %s217_s0 = smov [#allocation8]  }
  0x1e   :  { %v63_v2 = vld [vmem:[#allocation2] sm:$0xff]  ;;  %v64_v3 = vld [vmem:[#allocation2 + $0x8] sm:$0xff]  ;;  %vm65_vm0 = vcmp.ne.f32.partialorder %v61_v0, -999.0  ;;  %vm66_vm1 = vcmp.ne.f32.partialorder %v62_v1, -999.0  ;;  %s101_s24 = sshll.u32 %s217_s0, 4  ;;  %s218_s1 = smov [#allocation7]   ;;  %s102_s24 = int_to_ptr.vmem [resolvable:$true] %s101_s24 }
  0x1f   :  { %v67_v4 = vsub.f32 %v63_v2, %v61_v0  ;;  %v68_v5 = vsub.f32 %v64_v3, %v62_v1  ;;  %v115_v7 = vsel %vm65_vm0, 1.0, %v216_v6  ;;  %v116_v8 = vsel %vm66_vm1, 1.0, %v216_v6  ;;  %s91_s25 = sshll.u32 %s218_s1, 4  ;;  %s164_s26 = scalar_lea.vmem %s102_s24, 128  ;;  %s92_s25 = int_to_ptr.vmem [resolvable:$true] %s91_s25 }
  0x20   :  { %v82_v10 = vadd.f32 %v116_v8, %v115_v7  ;;  %p165_p10 = scmp.ne.s32.totalorder %s102_s24, %s164_s26  ;;  %p169_p11 = scmp.lt.s32.totalorder %s102_s24, %s102_s24 }
  0x21   :  { %v69_v9 = vsel %vm65_vm0, %v67_v4, 0.0  ;;  %v70_v11 = vsel %vm66_vm1, %v68_v5, 0.0  ;;  %p170_p12 = scmp.lt.s32.totalorder %s164_s26, %s164_s26 }
  0x22   :  { %v71_v12 = vmul.f32 %v69_v9, %v69_v9  ;;  %v72_v13 = vmul.f32 %v70_v11, %v70_v11  ;;  %84 = vst [vmem:[#allocation8] sm:$0xff] %v82_v10 }
  0x23   :  { %p171_p13 = por %p170_p12, %p169_p11 }
  0x24   :  { %v78_v14 = vadd.f32 %v72_v13, %v71_v12 }
  0x25   :  { %p172_p0 = pnand %p171_p13, %p165_p10 }
  0x27   :  { %175 = shalt.err (!%p172_p0)
}
  0x28   :  { %104 = dma.vmem_to_hbm [thread:$0]  %s102_s24, 128, %s254_s3, [#allocation9]   ;;  %80 = vst [vmem:[#allocation7] sm:$0xff] %v78_v14 }
  0x29   :  { %s184_s29 = scalar_lea.vmem %s92_s25, 128  ;;  %p189_p2 = scmp.lt.s32.totalorder %s92_s25, %s92_s25 }
  0x2a   :  { %p185_p1 = scmp.ne.s32.totalorder %s92_s25, %s184_s29  ;;  %p190_p3 = scmp.lt.s32.totalorder %s184_s29, %s184_s29 }
  0x2c   :  { %p191_p4 = por %p190_p3, %p189_p2 }
  0x2e   :  { %p192_p5 = pnand %p191_p4, %p185_p1 }
  0x30   :  { %195 = shalt.err (!%p192_p5)
}
  0x31   :  { %94 = dma.vmem_to_hbm [thread:$0]  %s92_s25, 128, %s253_s2, [#allocation4]  }
  0x32   :  { %208 = dma.done.wait [#allocation4], 128  }
  0x33   :  { %209 = vsyncadd [#allocation4], 4294967168 }
  0x34   :  { %210 = dma.done.wait [#allocation9], 128  }
  0x35   :  { %211 = vsyncadd [#allocation9], 4294967168 }
  0x36   :  { %111 = vsyncpa [#allocation3], 1 }
  0x37   :  { %112 = vsyncpa [#allocation6], 1 }
  0x38   :  { %113 = vsyncpa [#allocation4], 1 }
  0x39   :  { %114 = vsyncpa [#allocation9], 1 }

</bundles_post_ra>
